<compile_context>
chip_gen: v7x
topology: tpu7x:2x2x1
jax: 0.10.0
libtpu: 0.0.40
codegen_flags: <defaults>
</compile_context>

<pallas_src>
import math

import jax
import jax.numpy as jnp
from jax import lax
from jax.experimental import pallas as pl
from jax.experimental.pallas import tpu as pltpu


# ----------------------------- config ---------------------------------------
BATCH = 2
SEQ = 8
HIDDEN = 32
NUM_HEADS = 2
HEAD_DIM = HIDDEN // NUM_HEADS
INTER = 4 * HIDDEN
LN_EPS = 1e-12
MASK_NEG = -1e30        # additive value excluding cross-batch/cross-head attention
ROWS = BATCH * SEQ      # flattened (batch, seq) rows
FROWS = NUM_HEADS * ROWS  # head-folded rows


# ----------------------------- kernel helpers -------------------------------
def _layernorm(x, w, b):
    # BertLayerNorm semantics: biased variance over last axis, eps inside sqrt.
    u = jnp.mean(x, axis=-1, keepdims=True)
    s = jnp.mean((x - u) ** 2, axis=-1, keepdims=True)
    return (x - u) * lax.rsqrt(s + LN_EPS) * w + b


def _gelu(x):
    # exact erf-based gelu (ACT2FN["gelu"] in the SASRec/FlatRec codebase)
    return x * 0.5 * (1.0 + lax.erf(x / math.sqrt(2.0)))


# ----------------------------- Pallas kernel --------------------------------
def flatrec_block_kernel(x_ref, mask_ref, wa_ref, w2_ref, vec_ref, out_ref):
    H, D, NH = HIDDEN, HEAD_DIM, NUM_HEADS

    x = x_ref[...]        # (ROWS, H)      whole batch flattened along rows
    mask = mask_ref[...]  # (FROWS, FROWS) additive, block-diag over head & batch
    wa = wa_ref[...]      # (H, 4H+INTER)  = [Wqkv | Wo | W1]
    vec = vec_ref[...]    # (8, 128)       packed bias / LayerNorm vectors

    # static slices of the packed slabs (free)
    wqkv = wa[:, 0:3 * H]
    wo = wa[:, 3 * H:4 * H]
    w1 = wa[:, 4 * H:4 * H + INTER]

    bqkv = vec[0:1, 0:3 * H]
    bo = vec[1:2, 0:H]
    ln1w = vec[2:3, 0:H]
    ln1b = vec[3:4, 0:H]
    b1 = vec[4:5, 0:INTER]
    b2 = vec[5:6, 0:H]
    ln2w = vec[6:7, 0:H]
    ln2b = vec[7:8, 0:H]

    # --- fused q/k/v projection: ONE MXU matmul --------------------------------
    qkv = jnp.dot(x, wqkv, preferred_element_type=jnp.float32) + bqkv   # (ROWS, 3H)

    # fold heads onto rows: (ROWS, H) -> (NH*ROWS, D)  (sublane concat, XLU slot)
    def fold(t):
        return jnp.concatenate([t[:, h * D:(h + 1) * D] for h in range(NH)], axis=0)

    qf = fold(qkv[:, 0:H])
    kf = fold(qkv[:, H:2 * H])
    vf = fold(qkv[:, 2 * H:3 * H])

    # --- single attention pass for all heads and batches -----------------------
    s = lax.dot_general(qf, kf, (((1,), (1,)), ((), ())),
                        preferred_element_type=jnp.float32)             # (FROWS, FROWS)
    s = s * (1.0 / math.sqrt(D)) + mask
    s = s - jnp.max(s, axis=-1, keepdims=True)
    p = jnp.exp(s)
    p = p * pl.reciprocal(jnp.sum(p, axis=-1, keepdims=True), approx=False)

    ctxf = jnp.dot(p, vf, preferred_element_type=jnp.float32)           # (FROWS, D)

    # re-join heads along lanes: (NH*ROWS, D) -> (ROWS, H)  (lane concat, XLU slot)
    ctx = jnp.concatenate(
        [ctxf[h * ROWS:(h + 1) * ROWS, :] for h in range(NH)], axis=1)

    # --- single output projection + residual LayerNorm -------------------------
    attn = jnp.dot(ctx, wo, preferred_element_type=jnp.float32) + bo
    h1 = _layernorm(attn + x, ln1w, ln1b)

    # --- feed forward (inner activation is lane-dense: INTER = 128 lanes) ------
    inter = _gelu(jnp.dot(h1, w1, preferred_element_type=jnp.float32) + b1)
    ffn = jnp.dot(inter, w2_ref[...], preferred_element_type=jnp.float32) + b2
    out_ref[...] = _layernorm(ffn + h1, ln2w, ln2b)


# ----------------------------- wrapper ---------------------------------------
def _vmem_spec():
    return pl.BlockSpec(memory_space=pltpu.MemorySpace.VMEM)


@jax.jit
def flatrec_attention_block(x, mask, params):
    B, S, H = x.shape
    R = B * S
    x2d = x.reshape(R, H)

    # --- weight slab: [Wq|Wk|Wv | Wo | W1] -> (H, 4H + INTER)  (one DMA) -------
    wqkv = jnp.concatenate([params["wq"], params["wk"], params["wv"]], axis=1)
    w_a = jnp.concatenate([wqkv, params["wo"], params["w1"]], axis=1)

    # --- packed small-vector slab: one (8, 128) f32 tile (one DMA) -------------
    def row(v):
        v = v.reshape(-1)
        return jnp.pad(v, (0, 128 - v.shape[0]))[None, :]

    bqkv = jnp.concatenate([params["bq"], params["bk"], params["bv"]], axis=1)
    vec_slab = jnp.concatenate(
        [row(bqkv), row(params["bo"]),
         row(params["ln1_w"]), row(params["ln1_b"]),
         row(params["b1"]), row(params["b2"]),
         row(params["ln2_w"]), row(params["ln2_b"])], axis=0)

    # --- (B,S,S) additive mask -> (NH*R, NH*R) block-diag over batch AND head --
    # (toy-size trick: quadratic in B*S, drop for large shapes and tile instead)
    eyeB = jnp.eye(B, dtype=jnp.float32)[:, None, :, None]             # (B,1,B,1)
    mbd = (eyeB * mask[:, :, None, :] + (1.0 - eyeB) * MASK_NEG).reshape(R, R)
    eyeH = jnp.eye(NUM_HEADS, dtype=jnp.float32)[:, None, :, None]     # (NH,1,NH,1)
    mask_big = (eyeH * mbd[None, :, None, :]
                + (1.0 - eyeH) * MASK_NEG).reshape(NUM_HEADS * R, NUM_HEADS * R)

    out2d = pl.pallas_call(
        flatrec_block_kernel,
        out_shape=jax.ShapeDtypeStruct((R, H), jnp.float32),
        in_specs=[_vmem_spec() for _ in range(5)],
        out_specs=_vmem_spec(),
    )(x2d, mask_big, w_a, params["w2"], vec_slab)
    return out2d.reshape(B, S, H)


# ----------------------------- pure JAX reference ----------------------------
def reference(x, mask, p):
    q = x @ p["wq"] + p["bq"][0]
    k = x @ p["wk"] + p["bk"][0]
    v = x @ p["wv"] + p["bv"][0]
    B, S, H = x.shape

    def split(t):  # (B,S,H) -> (B,heads,S,dh)
        return t.reshape(B, S, NUM_HEADS, HEAD_DIM).transpose(0, 2, 1, 3)

    qh, kh, vh = split(q), split(k), split(v)
    scores = jnp.einsum("bhqd,bhkd->bhqk", qh, kh) / math.sqrt(HEAD_DIM)
    scores = scores + mask[:, None, :, :]
    probs = jax.nn.softmax(scores, axis=-1)
    ctx = jnp.einsum("bhqk,bhkd->bhqd", probs, vh)
    ctx = ctx.transpose(0, 2, 1, 3).reshape(B, S, H)
    attn = ctx @ p["wo"] + p["bo"][0]

    def ln(t, w, b):
        u = jnp.mean(t, axis=-1, keepdims=True)
        s = jnp.mean((t - u) ** 2, axis=-1, keepdims=True)
        return (t - u) / jnp.sqrt(s + LN_EPS) * w[0] + b[0]

    h1 = ln(attn + x, p["ln1_w"], p["ln1_b"])
    inter = _gelu(h1 @ p["w1"] + p["b1"][0])
    ffn = inter @ p["w2"] + p["b2"][0]
    return ln(ffn + h1, p["ln2_w"], p["ln2_b"])


# ----------------------------- main ------------------------------------------
if __name__ == "__main__":
    key = jax.random.PRNGKey(0)
    keys = jax.random.split(key, 16)

    def init(k, shape, scale=0.02):
        return (scale * jax.random.normal(k, shape)).astype(jnp.float32)

    params = {
        "wq": init(keys[0], (HIDDEN, HIDDEN)), "bq": init(keys[1], (1, HIDDEN)),
        "wk": init(keys[2], (HIDDEN, HIDDEN)), "bk": init(keys[3], (1, HIDDEN)),
        "wv": init(keys[4], (HIDDEN, HIDDEN)), "bv": init(keys[5], (1, HIDDEN)),
        "wo": init(keys[6], (HIDDEN, HIDDEN)), "bo": init(keys[7], (1, HIDDEN)),
        "ln1_w": jnp.ones((1, HIDDEN), jnp.float32),
        "ln1_b": jnp.zeros((1, HIDDEN), jnp.float32),
        "w1": init(keys[8], (HIDDEN, INTER)), "b1": init(keys[9], (1, INTER)),
        "w2": init(keys[10], (INTER, HIDDEN)), "b2": init(keys[11], (1, HIDDEN)),
        "ln2_w": jnp.ones((1, HIDDEN), jnp.float32),
        "ln2_b": jnp.zeros((1, HIDDEN), jnp.float32),
    }

    x = jax.random.normal(keys[12], (BATCH, SEQ, HIDDEN), jnp.float32)

    # causal additive mask, SASRec-style: 0 where attended, -10000 where masked
    causal = jnp.tril(jnp.ones((SEQ, SEQ), jnp.float32))
    mask = ((1.0 - causal) * -10000.0)[None].repeat(BATCH, axis=0)  # (B, S, S)

    out = flatrec_attention_block(x, mask, params)
    out = jax.block_until_ready(out)

    ref = reference(x, mask, params)
    assert out.shape == (BATCH, SEQ, HIDDEN)
    assert jnp.allclose(out, ref, atol=1e-4, rtol=1e-4), "mismatch vs reference"

    print("KERNEL_OK")
</pallas_src>

<mosaic_0001>
module attributes {stable_mosaic.version = 11 : i64} {
  func.func @flatrec_block_kernel(%arg0: memref<16x32xf32, #tpu.memory_space<vmem>>, %arg1: memref<32x32xf32, #tpu.memory_space<vmem>>, %arg2: memref<32x256xf32, #tpu.memory_space<vmem>>, %arg3: memref<128x32xf32, #tpu.memory_space<vmem>>, %arg4: memref<8x128xf32, #tpu.memory_space<vmem>>, %arg5: memref<16x32xf32, #tpu.memory_space<vmem>>) attributes {dimension_semantics = [], scalar_prefetch = 0 : i64, scratch_operands = 0 : i64, tpu.core_type = #tpu.core_type<tc>} {
    %c0 = arith.constant 0 : index
    %c0_0 = arith.constant 0 : index
    %0 = vector.load %arg0[%c0, %c0_0] : memref<16x32xf32, #tpu.memory_space<vmem>>, vector<16x32xf32>
    %c0_1 = arith.constant 0 : index
    %c0_2 = arith.constant 0 : index
    %1 = vector.load %arg1[%c0_1, %c0_2] : memref<32x32xf32, #tpu.memory_space<vmem>>, vector<32x32xf32>
    %c0_3 = arith.constant 0 : index
    %c0_4 = arith.constant 0 : index
    %2 = vector.load %arg2[%c0_3, %c0_4] : memref<32x256xf32, #tpu.memory_space<vmem>>, vector<32x256xf32>
    %c0_5 = arith.constant 0 : index
    %c0_6 = arith.constant 0 : index
    %3 = vector.load %arg4[%c0_5, %c0_6] : memref<8x128xf32, #tpu.memory_space<vmem>>, vector<8x128xf32>
    %4 = vector.extract_strided_slice %2 {offsets = [0, 0], sizes = [32, 96], strides = [1, 1]} : vector<32x256xf32> to vector<32x96xf32>
    %5 = vector.extract_strided_slice %2 {offsets = [0, 96], sizes = [32, 32], strides = [1, 1]} : vector<32x256xf32> to vector<32x32xf32>
    %6 = vector.extract_strided_slice %2 {offsets = [0, 128], sizes = [32, 128], strides = [1, 1]} : vector<32x256xf32> to vector<32x128xf32>
    %7 = vector.extract_strided_slice %3 {offsets = [0, 0], sizes = [1, 96], strides = [1, 1]} : vector<8x128xf32> to vector<1x96xf32>
    %8 = vector.extract_strided_slice %3 {offsets = [1, 0], sizes = [1, 32], strides = [1, 1]} : vector<8x128xf32> to vector<1x32xf32>
    %9 = vector.extract_strided_slice %3 {offsets = [2, 0], sizes = [1, 32], strides = [1, 1]} : vector<8x128xf32> to vector<1x32xf32>
    %10 = vector.extract_strided_slice %3 {offsets = [3, 0], sizes = [1, 32], strides = [1, 1]} : vector<8x128xf32> to vector<1x32xf32>
    %11 = vector.extract_strided_slice %3 {offsets = [4, 0], sizes = [1, 128], strides = [1, 1]} : vector<8x128xf32> to vector<1x128xf32>
    %12 = vector.extract_strided_slice %3 {offsets = [5, 0], sizes = [1, 32], strides = [1, 1]} : vector<8x128xf32> to vector<1x32xf32>
    %13 = vector.extract_strided_slice %3 {offsets = [6, 0], sizes = [1, 32], strides = [1, 1]} : vector<8x128xf32> to vector<1x32xf32>
    %14 = vector.extract_strided_slice %3 {offsets = [7, 0], sizes = [1, 32], strides = [1, 1]} : vector<8x128xf32> to vector<1x32xf32>
    %cst = arith.constant dense<0.000000e+00> : vector<16x96xf32>
    %15 = tpu.matmul %0, %4, %cst {dimension_numbers = #tpu.dot_dimension_numbers<[1], [0], [0], [1], [0, 0, 1, 1], [], []>} : vector<16x32xf32>, vector<32x96xf32>, vector<16x96xf32> -> vector<16x96xf32>
    %16 = vector.broadcast %7 : vector<1x96xf32> to vector<16x96xf32>
    %17 = arith.addf %15, %16 : vector<16x96xf32>
    %18 = vector.extract_strided_slice %17 {offsets = [0, 0], sizes = [16, 32], strides = [1, 1]} : vector<16x96xf32> to vector<16x32xf32>
    %19 = vector.extract_strided_slice %18 {offsets = [0, 0], sizes = [16, 16], strides = [1, 1]} : vector<16x32xf32> to vector<16x16xf32>
    %20 = vector.extract_strided_slice %18 {offsets = [0, 16], sizes = [16, 16], strides = [1, 1]} : vector<16x32xf32> to vector<16x16xf32>
    %21 = tpu.concatenate %19, %20 in 0 : vector<16x16xf32>, vector<16x16xf32> -> vector<32x16xf32>
    %22 = vector.extract_strided_slice %17 {offsets = [0, 32], sizes = [16, 32], strides = [1, 1]} : vector<16x96xf32> to vector<16x32xf32>
    %23 = vector.extract_strided_slice %22 {offsets = [0, 0], sizes = [16, 16], strides = [1, 1]} : vector<16x32xf32> to vector<16x16xf32>
    %24 = vector.extract_strided_slice %22 {offsets = [0, 16], sizes = [16, 16], strides = [1, 1]} : vector<16x32xf32> to vector<16x16xf32>
    %25 = tpu.concatenate %23, %24 in 0 : vector<16x16xf32>, vector<16x16xf32> -> vector<32x16xf32>
    %26 = vector.extract_strided_slice %17 {offsets = [0, 64], sizes = [16, 32], strides = [1, 1]} : vector<16x96xf32> to vector<16x32xf32>
    %27 = vector.extract_strided_slice %26 {offsets = [0, 0], sizes = [16, 16], strides = [1, 1]} : vector<16x32xf32> to vector<16x16xf32>
    %28 = vector.extract_strided_slice %26 {offsets = [0, 16], sizes = [16, 16], strides = [1, 1]} : vector<16x32xf32> to vector<16x16xf32>
    %29 = tpu.concatenate %27, %28 in 0 : vector<16x16xf32>, vector<16x16xf32> -> vector<32x16xf32>
    %cst_7 = arith.constant dense<0.000000e+00> : vector<32x32xf32>
    %30 = tpu.matmul %21, %25, %cst_7 {dimension_numbers = #tpu.dot_dimension_numbers<[1], [1], [0], [0], [0, 0, 1, 0], [], []>} : vector<32x16xf32>, vector<32x16xf32>, vector<32x32xf32> -> vector<32x32xf32>
    %cst_8 = arith.constant 2.500000e-01 : f32
    %31 = vector.broadcast %cst_8 : f32 to vector<32x32xf32>
    %32 = arith.mulf %30, %31 : vector<32x32xf32>
    %33 = arith.addf %32, %1 : vector<32x32xf32>
    %cst_9 = arith.constant dense<0xFF800000> : vector<32xf32>
    %34 = vector.multi_reduction <maximumf>, %33, %cst_9 [1] : vector<32x32xf32> to vector<32xf32>
    %35 = vector.shape_cast %34 : vector<32xf32> to vector<32x1xf32>
    %36 = vector.broadcast %35 : vector<32x1xf32> to vector<32x32xf32>
    %37 = arith.subf %33, %36 : vector<32x32xf32>
    %38 = math.exp %37 : vector<32x32xf32>
    %cst_10 = arith.constant dense<0.000000e+00> : vector<32xf32>
    %39 = vector.multi_reduction <add>, %38, %cst_10 [1] : vector<32x32xf32> to vector<32xf32>
    %40 = vector.shape_cast %39 : vector<32xf32> to vector<32x1xf32>
    %41 = tpu.reciprocal %40 : vector<32x1xf32> -> vector<32x1xf32>
    %42 = vector.broadcast %41 : vector<32x1xf32> to vector<32x32xf32>
    %43 = arith.mulf %38, %42 : vector<32x32xf32>
    %cst_11 = arith.constant dense<0.000000e+00> : vector<32x16xf32>
    %44 = tpu.matmul %43, %29, %cst_11 {dimension_numbers = #tpu.dot_dimension_numbers<[1], [0], [0], [1], [0, 0, 1, 1], [], []>} : vector<32x32xf32>, vector<32x16xf32>, vector<32x16xf32> -> vector<32x16xf32>
    %45 = vector.extract_strided_slice %44 {offsets = [0, 0], sizes = [16, 16], strides = [1, 1]} : vector<32x16xf32> to vector<16x16xf32>
    %46 = vector.extract_strided_slice %44 {offsets = [16, 0], sizes = [16, 16], strides = [1, 1]} : vector<32x16xf32> to vector<16x16xf32>
    %47 = tpu.concatenate %45, %46 in 1 : vector<16x16xf32>, vector<16x16xf32> -> vector<16x32xf32>
    %cst_12 = arith.constant dense<0.000000e+00> : vector<16x32xf32>
    %48 = tpu.matmul %47, %5, %cst_12 {dimension_numbers = #tpu.dot_dimension_numbers<[1], [0], [0], [1], [0, 0, 1, 1], [], []>} : vector<16x32xf32>, vector<32x32xf32>, vector<16x32xf32> -> vector<16x32xf32>
    %49 = vector.broadcast %8 : vector<1x32xf32> to vector<16x32xf32>
    %50 = arith.addf %48, %49 : vector<16x32xf32>
    %51 = arith.addf %50, %0 : vector<16x32xf32>
    %cst_13 = arith.constant dense<0.000000e+00> : vector<16xf32>
    %52 = vector.multi_reduction <add>, %51, %cst_13 [1] : vector<16x32xf32> to vector<16xf32>
    %53 = vector.shape_cast %52 : vector<16xf32> to vector<16x1xf32>
    %cst_14 = arith.constant 3.200000e+01 : f32
    %54 = vector.broadcast %cst_14 : f32 to vector<16x1xf32>
    %55 = arith.divf %53, %54 : vector<16x1xf32>
    %56 = vector.broadcast %55 : vector<16x1xf32> to vector<16x32xf32>
    %57 = arith.subf %51, %56 : vector<16x32xf32>
    %58 = arith.mulf %57, %57 : vector<16x32xf32>
    %cst_15 = arith.constant dense<0.000000e+00> : vector<16xf32>
    %59 = vector.multi_reduction <add>, %58, %cst_15 [1] : vector<16x32xf32> to vector<16xf32>
    %60 = vector.shape_cast %59 : vector<16xf32> to vector<16x1xf32>
    %cst_16 = arith.constant 3.200000e+01 : f32
    %61 = vector.broadcast %cst_16 : f32 to vector<16x1xf32>
    %62 = arith.divf %60, %61 : vector<16x1xf32>
    %63 = vector.broadcast %55 : vector<16x1xf32> to vector<16x32xf32>
    %64 = arith.subf %51, %63 : vector<16x32xf32>
    %cst_17 = arith.constant 9.99999996E-13 : f32
    %65 = vector.broadcast %cst_17 : f32 to vector<16x1xf32>
    %66 = arith.addf %62, %65 : vector<16x1xf32>
    %67 = math.rsqrt %66 : vector<16x1xf32>
    %68 = vector.broadcast %67 : vector<16x1xf32> to vector<16x32xf32>
    %69 = arith.mulf %64, %68 : vector<16x32xf32>
    %70 = vector.broadcast %9 : vector<1x32xf32> to vector<16x32xf32>
    %71 = arith.mulf %69, %70 : vector<16x32xf32>
    %72 = vector.broadcast %10 : vector<1x32xf32> to vector<16x32xf32>
    %73 = arith.addf %71, %72 : vector<16x32xf32>
    %cst_18 = arith.constant dense<0.000000e+00> : vector<16x128xf32>
    %74 = tpu.matmul %73, %6, %cst_18 {dimension_numbers = #tpu.dot_dimension_numbers<[1], [0], [0], [1], [0, 0, 1, 1], [], []>} : vector<16x32xf32>, vector<32x128xf32>, vector<16x128xf32> -> vector<16x128xf32>
    %75 = vector.broadcast %11 : vector<1x128xf32> to vector<16x128xf32>
    %76 = arith.addf %74, %75 : vector<16x128xf32>
    %cst_19 = arith.constant 5.000000e-01 : f32
    %77 = vector.broadcast %cst_19 : f32 to vector<16x128xf32>
    %78 = arith.mulf %76, %77 : vector<16x128xf32>
    %cst_20 = arith.constant 1.41421354 : f32
    %79 = vector.broadcast %cst_20 : f32 to vector<16x128xf32>
    %80 = arith.divf %76, %79 : vector<16x128xf32>
    %81 = math.erf %80 : vector<16x128xf32>
    %cst_21 = arith.constant 1.000000e+00 : f32
    %82 = vector.broadcast %cst_21 : f32 to vector<16x128xf32>
    %83 = arith.addf %82, %81 : vector<16x128xf32>
    %84 = arith.mulf %78, %83 : vector<16x128xf32>
    %c0_22 = arith.constant 0 : index
    %c0_23 = arith.constant 0 : index
    %85 = vector.load %arg3[%c0_22, %c0_23] : memref<128x32xf32, #tpu.memory_space<vmem>>, vector<128x32xf32>
    %cst_24 = arith.constant dense<0.000000e+00> : vector<16x32xf32>
    %86 = tpu.matmul %84, %85, %cst_24 {dimension_numbers = #tpu.dot_dimension_numbers<[1], [0], [0], [1], [0, 0, 1, 1], [], []>} : vector<16x128xf32>, vector<128x32xf32>, vector<16x32xf32> -> vector<16x32xf32>
    %87 = vector.broadcast %12 : vector<1x32xf32> to vector<16x32xf32>
    %88 = arith.addf %86, %87 : vector<16x32xf32>
    %89 = arith.addf %88, %73 : vector<16x32xf32>
    %cst_25 = arith.constant dense<0.000000e+00> : vector<16xf32>
    %90 = vector.multi_reduction <add>, %89, %cst_25 [1] : vector<16x32xf32> to vector<16xf32>
    %91 = vector.shape_cast %90 : vector<16xf32> to vector<16x1xf32>
    %cst_26 = arith.constant 3.200000e+01 : f32
    %92 = vector.broadcast %cst_26 : f32 to vector<16x1xf32>
    %93 = arith.divf %91, %92 : vector<16x1xf32>
    %94 = vector.broadcast %93 : vector<16x1xf32> to vector<16x32xf32>
    %95 = arith.subf %89, %94 : vector<16x32xf32>
    %96 = arith.mulf %95, %95 : vector<16x32xf32>
    %cst_27 = arith.constant dense<0.000000e+00> : vector<16xf32>
    %97 = vector.multi_reduction <add>, %96, %cst_27 [1] : vector<16x32xf32> to vector<16xf32>
    %98 = vector.shape_cast %97 : vector<16xf32> to vector<16x1xf32>
    %cst_28 = arith.constant 3.200000e+01 : f32
    %99 = vector.broadcast %cst_28 : f32 to vector<16x1xf32>
    %100 = arith.divf %98, %99 : vector<16x1xf32>
    %101 = vector.broadcast %93 : vector<16x1xf32> to vector<16x32xf32>
    %102 = arith.subf %89, %101 : vector<16x32xf32>
    %cst_29 = arith.constant 9.99999996E-13 : f32
    %103 = vector.broadcast %cst_29 : f32 to vector<16x1xf32>
    %104 = arith.addf %100, %103 : vector<16x1xf32>
    %105 = math.rsqrt %104 : vector<16x1xf32>
    %106 = vector.broadcast %105 : vector<16x1xf32> to vector<16x32xf32>
    %107 = arith.mulf %102, %106 : vector<16x32xf32>
    %108 = vector.broadcast %13 : vector<1x32xf32> to vector<16x32xf32>
    %109 = arith.mulf %107, %108 : vector<16x32xf32>
    %110 = vector.broadcast %14 : vector<1x32xf32> to vector<16x32xf32>
    %111 = arith.addf %109, %110 : vector<16x32xf32>
    %c0_30 = arith.constant 0 : index
    %c0_31 = arith.constant 0 : index
    %112 = vector.load %arg5[%c0_30, %c0_31] : memref<16x32xf32, #tpu.memory_space<vmem>>, vector<16x32xf32>
    tpu.vector_store %arg5[%c0_30, %c0_31], %111 {strides = array<i32>} : memref<16x32xf32, #tpu.memory_space<vmem>>, vector<16x32xf32>,
    return
  }
}

</mosaic_0001>

<bundles_post_ra>
// kernel: flatrec_attention_block.1
= control target key start
LH: loop header
LB: loop body
LE: loop exit
PB: predicated region body
PF: predicated region fallthrough
CT: control target
= control target key end

     0   :  { %vm40_vm0 = vcmask 261120   ;;  %s1366_s0 = inlined_call_operand.vmem [shape: f32[16,32], index: 0, kind: input, shape index: {}]   ;;  %s1367_s1 = inlined_call_operand.vmem [shape: f32[32,32], index: 1, kind: input, shape index: {}]   ;;  %s1368_s2 = inlined_call_operand.vmem [shape: f32[32,256], index: 2, kind: input, shape index: {}]   ;;  %s1369_s3 = inlined_call_operand.vmem [shape: f32[128,32], index: 3, kind: input, shape index: {}]   ;;  %s1370_s4 = inlined_call_operand.vmem [shape: f32[8,128], index: 4, kind: input, shape index: {}]   ;;  %s1371_s5 = inlined_call_operand.hbm [shape: f32[16,32], index: 5, kind: output, shape index: {}]  }
   0x1   :  { %v1173_v0 = vld [vmem:[%s1368_s2] sm:$0xff]  ;;  %v1178_v1 = vld [vmem:[%s1368_s2 + $0x10] sm:$0xff] }
   0x2   :  { %v1183_v2 = vld [vmem:[%s1368_s2 + $0x20] sm:$0xff]  ;;  %v1070_v3 = vpack.i.bf16 %v1178_v1, %v1173_v0  ;;  %v966_v4 = vpack.c.bf16 %v1178_v1, %v1173_v0  ;;  %v1192_v5 = vld [vmem:[%s1368_s2 + $0x30] sm:$0xff] }
   0x3   :  { %v1197_v6 = vld [vmem:[%s1366_s0] sm:$0xff]  ;;  %v970_v7 = vpack.c.bf16 %v1192_v5, %v1183_v2 }
   0x4   :  { %878 = vmatprep.mubr.msk.f32.mxu1 %vm40_vm0, %v1197_v6 }
   0x5   :  { %10 = vsyncpa [#allocation3], 0  ;;  %967 = vmatprep.subr.bf16.mxu1 %v966_v4  ;;  %v1206_v8 = vld [vmem:[%s1366_s0 + $0x8] sm:$0xff]  ;;  %v36_v9 = vlaneseq  ;;  %v1216_v12 = vld [vmem:[%s1370_s4] sm:$0xff]  ;;  %vm136_vm1 = vcmask 130048   ;;  %s1132_s0 = smov 112  }
   0x6   :  { %969 = vmatpush3.bf16.msra.mxu1 %v966_v4  ;;  %s1133_s7 = smov 96   ;;  %vm975_vm2 = vmpackc.low %vm136_vm1, %vm136_vm1  ;;  %v24_v31 = vld [vmem:[%s1367_s1 + $0x8] sm:$0xff]  ;;  %v23_v34 = vld [vmem:[%s1367_s1] sm:$0xff]  ;;  %s1135_s15 = smov 32  }
   0x7   :  { %971 = vmatprep.subr.bf16.mxu1 %v970_v7  ;;  %v1210_v10 = vshrl.u32 %v36_v9, 7  ;;  %v25_v41 = vld [vmem:[%s1367_s1 + $0x10] sm:$0xff]  ;;  %v26_v45 = vld [vmem:[%s1367_s1 + $0x18] sm:$0xff]  ;;  %s1134_s1 = smov 64   ;;  %s1136_s16 = smov 16  }
   0x9   :  { %v38_v11 = vsub.s32 0, %v1210_v10 }
   0xa   :  { %973 = vmatpush3.bf16.msra.mxu1 %v970_v7 }
   0xb   :  { %v39_v13 = vrot.slane %v1216_v12, %v38_v11 }
   0xd   :  { %879 = vmatmul.mubr.msk.f32.vlgmr.msra.gmra.mrb[0].mxu1 %vm40_vm0, %v1206_v8 }
  0xe0   :  { %v880_v14 = vpop.f32.mrb[0].mxu1 }
  0xe1   :  { %v119_v15 = vadd.f32 %v880_v14, %v39_v13  ;;  %v113_v16 = vpop.f32.mrb[1].mxu1 }
  0xe2   :  { %v114_v17 = vadd.f32 %v113_v16, %v39_v13 }
  0xe4   :  { %124 = vrot.lane.b32.xlu0 %v114_v17, %s1132_s0  ;;  %889 = vmatprep.mubr.msk.f32.mxu1 %vm136_vm1, %v114_v17  ;;  %v1220_v18 = vpack.i.bf16 %v119_v15, %v114_v17 }
  0xe6   :  { %1051 = vrot.lane.b32.xlu1 %v1220_v18, %s1133_s7 }
  0xe8   :  { %126 = vrot.lane.b32.xlu0 %v119_v15, %s1132_s0 }
 0x156   :  { %v125_v19 = vpop.permute.xlu0 %124 }
 0x158   :  { %v1052_v20 = vpop.permute.xlu1 %1051 }
 0x159   :  { %v1054_v21 = vunpack.i.h.bf16 %v1052_v20  ;;  %v1053_v22 = vunpack.i.l.bf16 %v1052_v20 }
 0x15a   :  { %v127_v23 = vpop.permute.xlu0 %126 }
 0x15b   :  { %v974_v24 = vpack.c.bf16 %v1054_v21, %v1053_v22  ;;  %v1225_v25 = vpack.i.bf16 %v127_v23, %v125_v19 }
 0x15d   :  { %976 = vmatprep.subr.msk.bf16.mxu1 %vm975_vm2, %v974_v24  ;;  %1056 = vrot.lane.b32.xlu1 %v1225_v25, %s1133_s7 }
 0x15e   :  { %979 = vmatpush3.bf16.xpose.msk.msra.mxu1 %vm975_vm2, %v974_v24 }
 0x1cf   :  { %v1057_v26 = vpop.permute.xlu1 %1056 }
 0x1d0   :  { %v1059_v27 = vunpack.i.h.bf16 %v1057_v26  ;;  %v1058_v28 = vunpack.i.l.bf16 %v1057_v26 }
 0x1d2   :  { %v980_v29 = vpack.c.bf16 %v1059_v27, %v1058_v28 }
 0x1d4   :  { %982 = vmatprep.subr.msk.bf16.mxu1 %vm975_vm2, %v980_v29 }
 0x1d5   :  { %985 = vmatpush3.bf16.xpose.msk.msra.mxu1 %vm975_vm2, %v980_v29 }
 0x1dc   :  { %890 = vmatmul.mubr.msk.f32.vlgmr.msra.gmra.mrb[2].mxu1 %vm136_vm1, %v119_v15  ;;  %v1075_v15 = vpack.i.bf16 %v1192_v5, %v1183_v2 }
 0x1dd   :  { %892 = vmatprep.mubr.msk.f32.mxu1 %vm136_vm1, %v125_v19 }
 0x1e0   :  { %893 = vmatmul.mubr.msk.f32.gmra.mrb[4].mxu1 %vm136_vm1, %v127_v23 }
 0x2af   :  { %v891_v30 = vpop.f32.mrb[2].mxu1 }
 0x2b0   :  { %v239_v32 = vmul.f32 0.25, %v891_v30  ;;  %v219_v33 = vpop.f32.mrb[3].mxu1 }
 0x2b1   :  { %v238_v35 = vmul.f32 0.25, %v219_v33 }
 0x2b2   :  { %v243_v36 = vadd.f32 %v239_v32, %v24_v31 }
 0x2b3   :  { %v894_v37 = vpop.f32.mrb[4].mxu1  ;;  %v242_v38 = vadd.f32 %v238_v35, %v23_v34 }
 0x2b4   :  { %v229_v39 = vpop.f32.mrb[5].mxu1  ;;  %v249_v40 = vsel %vm40_vm0, %v243_v36, -inf  ;;  %v241_v42 = vmul.f32 0.25, %v894_v37 }
 0x2b5   :  { %v240_v43 = vmul.f32 0.25, %v229_v39  ;;  %250 = vmax.xlane.f32.xlu1 %v249_v40  ;;  %v246_v44 = vsel %vm40_vm0, %v242_v38, -inf }
 0x2b6   :  { %247 = vmax.xlane.f32.xlu0 %v246_v44  ;;  %v245_v48 = vadd.f32 %v241_v42, %v26_v45 }
 0x2b7   :  { %v244_v46 = vadd.f32 %v240_v43, %v25_v41 }
 0x2b8   :  { %v255_v49 = vsel %vm40_vm0, %v245_v48, -inf }
 0x2b9   :  { %v252_v47 = vsel %vm40_vm0, %v244_v46, -inf }
 0x2ba   :  { %253 = vmax.xlane.f32.xlu0 %v252_v47  ;;  %v411_v47 = vsub.s32 1, %v1210_v10 }
 0x2be   :  { %256 = vmax.xlane.f32.xlu0 %v255_v49 }
 0x342   :  { %v251_v50 = vpop.xlane.xlu1 %250 }
 0x343   :  { %v259_v51 = vsub.f32 %v243_v36, %v251_v50  ;;  %v248_v52 = vpop.xlane.xlu0 %247 }
 0x344   :  { %v258_v53 = vsub.f32 %v242_v38, %v248_v52 }
 0x345   :  { %v264_v54 = vmul.f32 1.442695, %v259_v51 }
 0x346   :  { %v262_v55 = vmul.f32 1.442695, %v258_v53 }
 0x347   :  { %1080 = vpow2.f32 %v264_v54  ;;  %v254_v56 = vpop.xlane.xlu0 %253 }
 0x348   :  { %1082 = vpow2.f32 %v262_v55  ;;  %v260_v57 = vsub.f32 %v244_v46, %v254_v56 }
 0x34a   :  { %v266_v58 = vmul.f32 1.442695, %v260_v57 }
 0x34b   :  { %v257_v59 = vpop.xlane.xlu0 %256 }
 0x34c   :  { %1084 = vpow2.f32 %v266_v58  ;;  %v261_v60 = vsub.f32 %v245_v48, %v257_v59  ;;  %v412_v48 = vrot.slane %v1216_v12, %v411_v47  ;;  %v659_v47 = vld [vmem:[%s1369_s3 + $0x60] sm:$0xff] }
 0x34e   :  { %v268_v61 = vmul.f32 1.442695, %v261_v60 }
 0x350   :  { %1086 = vpow2.f32 %v268_v61 }
 0x351   :  { %v1081_v62 = vpop.eup %1080 }
 0x352   :  { %v1083_v63 = vpop.eup %1082  ;;  %v273_v4 = vsel %vm40_vm0, %v1081_v62, 0.0 }
 0x353   :  { %274 = vadd.xlane.f32.xlu0 %v273_v4  ;;  %v270_v7 = vsel %vm40_vm0, %v1083_v63, 0.0 }
 0x354   :  { %271 = vadd.xlane.f32.xlu1 %v270_v7 }
 0x356   :  { %v1085_v9 = vpop.eup %1084 }
 0x357   :  { %v276_v11 = vsel %vm40_vm0, %v1085_v9, 0.0 }
 0x358   :  { %277 = vadd.xlane.f32.xlu1 %v276_v11 }
 0x35a   :  { %v1087_v13 = vpop.eup %1086 }
 0x35b   :  { %v279_v14 = vsel %vm40_vm0, %v1087_v13, 0.0 }
 0x35c   :  { %280 = vadd.xlane.f32.xlu0 %v279_v14  ;;  %v34_v14 = vld [vmem:[%s1368_s2 + $0x38] sm:$0xff] }
 0x369   :  { %1061 = vrot.lane.b32.xlu1 %v1220_v18, %s1134_s1 }
 0x36d   :  { %1071 = vrot.lane.b32.xlu1 %v1070_v3, %s1135_s15 }
 0x371   :  { %1076 = vrot.lane.b32.xlu1 %v1075_v15, %s1135_s15 }
 0x372   :  { %1066 = vrot.lane.b32.xlu0 %v1225_v25, %s1134_s1 }
 0x3e0   :  { %v275_v17 = vpop.xlane.xlu0 %274 }
 0x3e1   :  { %v272_v16 = vpop.xlane.xlu1 %271 }
 0x3e2   :  { %1088 = vrcp.f32 %v272_v16  ;;  %v647_v16 = vld [vmem:[%s1369_s3] sm:$0xff] }
 0x3e3   :  { %1090 = vrcp.f32 %v275_v17  ;;  %v648_v17 = vld [vmem:[%s1369_s3 + $0x8] sm:$0xff] }
 0x3e5   :  { %v278_v19 = vpop.xlane.xlu1 %277 }
 0x3e6   :  { %1092 = vrcp.f32 %v278_v19  ;;  %v649_v19 = vld [vmem:[%s1369_s3 + $0x10] sm:$0xff] }
 0x3e9   :  { %v1062_v20 = vpop.permute.xlu1 %1061  ;;  %v281_v21 = vpop.xlane.xlu0 %280 }
 0x3ea   :  { %v1064_v18 = vunpack.i.h.bf16 %v1062_v20  ;;  %v1063_v22 = vunpack.i.l.bf16 %v1062_v20  ;;  %1094 = vrcp.f32 %v281_v21  ;;  %v1010_v20 = vpack.c.bf16 %v648_v17, %v647_v16  ;;  %v650_v21 = vld [vmem:[%s1369_s3 + $0x18] sm:$0xff] }
 0x3ec   :  { %v1089_v23 = vpop.eup %1088  ;;  %v986_v24 = vpack.c.bf16 %v1064_v18, %v1063_v22  ;;  %v1014_v18 = vpack.c.bf16 %v650_v21, %v649_v19  ;;  %v651_v22 = vld [vmem:[%s1369_s3 + $0x20] sm:$0xff] }
 0x3ed   :  { %v1067_v25 = vpop.permute.xlu0 %1066  ;;  %v286_v0 = vmul.f32 %v1089_v23, %v1083_v63  ;;  %v1091_v5 = vpop.eup %1090  ;;  %v652_v23 = vld [vmem:[%s1369_s3 + $0x28] sm:$0xff] }
 0x3ee   :  { %v1069_v1 = vunpack.i.h.bf16 %v1067_v25  ;;  %v1068_v3 = vunpack.i.l.bf16 %v1067_v25  ;;  %987 = vmatprep.subr.bf16.mxu1 %v986_v24  ;;  %v287_v27 = vmul.f32 %v1091_v5, %v1081_v62  ;;  %v1072_v31 = vpop.permute.xlu1 %1071 }
 0x3ef   :  { %989 = vmatpush3.bf16.msra.mxu1 %v986_v24  ;;  %903 = vmatprep.mubr.msk.f32.mxu1 %vm40_vm0, %v286_v0  ;;  %v1074_v32 = vunpack.i.h.bf16 %v1072_v31  ;;  %v1073_v33 = vunpack.i.l.bf16 %v1072_v31  ;;  %v1018_v24 = vpack.c.bf16 %v652_v23, %v651_v22 }
 0x3f0   :  { %v990_v2 = vpack.c.bf16 %v1069_v1, %v1068_v3  ;;  %v1093_v26 = vpop.eup %1092 }
 0x3f1   :  { %v288_v29 = vmul.f32 %v1093_v26, %v1085_v9  ;;  %v994_v34 = vpack.c.bf16 %v1074_v32, %v1073_v33  ;;  %v30_v9 = vld [vmem:[%s1368_s2 + $0x18] sm:$0xff]  ;;  %v541_v26 = vsub.s32 2, %v1210_v10 }
 0x3f2   :  { %991 = vmatprep.subr.bf16.mxu1 %v990_v2  ;;  %v1077_v35 = vpop.permute.xlu1 %1076 }
 0x3f3   :  { %993 = vmatpush3.bf16.msra.mxu1 %v990_v2  ;;  %v1079_v36 = vunpack.i.h.bf16 %v1077_v35  ;;  %v1078_v37 = vunpack.i.l.bf16 %v1077_v35  ;;  %995 = vmatprep.subr.bf16.mxu0 %v994_v34 }
 0x3f4   :  { %v1095_v28 = vpop.eup %1094  ;;  %997 = vmatpush3.bf16.msra.mxu0 %v994_v34 }
 0x3f5   :  { %v289_v30 = vmul.f32 %v1095_v28, %v1087_v13  ;;  %v998_v38 = vpack.c.bf16 %v1079_v36, %v1078_v37  ;;  %v32_v13 = vld [vmem:[%s1368_s2 + $0x28] sm:$0xff]  ;;  %v542_v28 = vrot.slane %v1216_v12, %v541_v26 }
 0x3f6   :  { %904 = vmatmul.mubr.msk.f32.vlgmr.msra.gmra.mrb[6].mxu1 %vm40_vm0, %v287_v27  ;;  %v1006_v15 = vpack.c.bf16 %v34_v14, %v32_v13  ;;  %v547_v27 = vsub.s32 3, %v1210_v10 }
 0x3f7   :  { %906 = vmatprep.mubr.msk.f32.mxu1 %vm40_vm0, %v288_v29  ;;  %999 = vmatprep.subr.bf16.mxu0 %v998_v38 }
 0x3f8   :  { %1001 = vmatpush3.bf16.msra.mxu0 %v998_v38  ;;  %v548_v31 = vrot.slane %v1216_v12, %v547_v27  ;;  %v653_v38 = vld [vmem:[%s1369_s3 + $0x30] sm:$0xff] }
 0x3f9   :  { %1011 = vmatprep.subr.bf16.mxu0 %v1010_v20 }
 0x3fa   :  { %907 = vmatmul.mubr.msk.f32.gmra.mrb[8].mxu1 %vm40_vm0, %v289_v30 }
 0x4c9   :  { %v905_v39 = vpop.f32.mrb[6].mxu1 }
 0x4ca   :  { %v380_v40 = vpop.f32.mrb[7].mxu1 }
 0x4cd   :  { %v908_v41 = vpop.f32.mrb[8].mxu1 }
 0x4ce   :  { %403 = vrot.lane.b32.xlu1 %v908_v41, %s1136_s16  ;;  %v390_v42 = vpop.f32.mrb[9].mxu1  ;;  %v655_v41 = vld [vmem:[%s1369_s3 + $0x40] sm:$0xff] }
 0x4cf   :  { %401 = vrot.lane.b32.xlu0 %v390_v42, %s1136_s16  ;;  %v656_v42 = vld [vmem:[%s1369_s3 + $0x48] sm:$0xff] }
 0x540   :  { %v404_v43 = vpop.permute.xlu1 %403 }
 0x541   :  { %v402_v44 = vpop.permute.xlu0 %401  ;;  %v408_v46 = vsel %vm136_vm1, %v905_v39, %v404_v43  ;;  %v654_v39 = vld [vmem:[%s1369_s3 + $0x38] sm:$0xff]  ;;  %v1026_v43 = vpack.c.bf16 %v656_v42, %v655_v41 }
 0x542   :  { %v407_v45 = vsel %vm136_vm1, %v380_v40, %v402_v44  ;;  %v1022_v40 = vpack.c.bf16 %v654_v39, %v653_v38  ;;  %v657_v44 = vld [vmem:[%s1369_s3 + $0x50] sm:$0xff] }
 0x543   :  { %917 = vmatprep.mubr.msk.f32.mxu0 %vm40_vm0, %v407_v45  ;;  %v658_v45 = vld [vmem:[%s1369_s3 + $0x58] sm:$0xff] }
 0x544   :  { %918 = vmatmul.mubr.msk.f32.vlgmr.msra.gmra.mrb[0].mxu0 %vm40_vm0, %v408_v46  ;;  %v1030_v46 = vpack.c.bf16 %v658_v45, %v657_v44 }
 0x545   :  { %1013 = vmatpush3.bf16.msra.mxu0 %v1010_v20 }
 0x546   :  { %1015 = vmatprep.subr.bf16.mxu0 %v1014_v18 }
 0x549   :  { %1017 = vmatpush3.bf16.msra.mxu0 %v1014_v18 }
 0x54a   :  { %1019 = vmatprep.subr.bf16.mxu0 %v1018_v24 }
 0x54d   :  { %1021 = vmatpush3.bf16.msra.mxu0 %v1018_v24 }
 0x54e   :  { %1023 = vmatprep.subr.bf16.mxu0 %v1022_v40 }
 0x551   :  { %1025 = vmatpush3.bf16.msra.mxu0 %v1022_v40 }
 0x552   :  { %1027 = vmatprep.subr.bf16.mxu0 %v1026_v43 }
 0x555   :  { %1029 = vmatpush3.bf16.msra.mxu0 %v1026_v43 }
 0x556   :  { %1031 = vmatprep.subr.bf16.mxu0 %v1030_v46 }
 0x559   :  { %1033 = vmatpush3.bf16.msra.mxu0 %v1030_v46 }
 0x617   :  { %v919_v49 = vpop.f32.mrb[0].mxu0 }
 0x618   :  { %v507_v50 = vadd.f32 %v919_v49, %v412_v48  ;;  %v501_v51 = vpop.f32.mrb[1].mxu0 }
 0x619   :  { %v502_v52 = vadd.f32 %v501_v51, %v412_v48  ;;  %v660_v48 = vld [vmem:[%s1369_s3 + $0x68] sm:$0xff]  ;;  %v662_v51 = vld [vmem:[%s1369_s3 + $0x78] sm:$0xff] }
 0x61a   :  { %v511_v53 = vadd.f32 %v507_v50, %v1206_v8  ;;  %v1034_v49 = vpack.c.bf16 %v660_v48, %v659_v47  ;;  %v661_v50 = vld [vmem:[%s1369_s3 + $0x70] sm:$0xff]  ;;  %s1137_s3 = smov [#allocation2]  }
 0x61b   :  { %v510_v54 = vadd.f32 %v502_v52, %v1197_v6  ;;  %v28_v6 = vld [vmem:[%s1368_s2 + $0x8] sm:$0xff]  ;;  %v1038_v52 = vpack.c.bf16 %v662_v51, %v661_v50  ;;  %s789_s28 = sshll.u32 %s1137_s3, 4  ;;  %s790_s28 = int_to_ptr.vmem [resolvable:$true] %s789_s28 }
 0x61c   :  { %v515_v55 = vsel %vm40_vm0, %v511_v53, 0.0  ;;  %v1002_v11 = vpack.c.bf16 %v30_v9, %v28_v6  ;;  %1035 = vmatprep.subr.bf16.mxu0 %v1034_v49  ;;  %s1108_s29 = scalar_lea.vmem %s790_s28, 256  ;;  %p1113_p1 = scmp.lt.s32.totalorder %s790_s28, %s790_s28 }
 0x61d   :  { %516 = vadd.xlane.f32.xlu1 %v515_v55  ;;  %v512_v56 = vsel %vm40_vm0, %v510_v54, 0.0  ;;  %1037 = vmatpush3.bf16.msra.mxu0 %v1034_v49  ;;  %p1109_p0 = scmp.ne.s32.totalorder %s790_s28, %s1108_s29  ;;  %p1114_p2 = scmp.lt.s32.totalorder %s1108_s29, %s1108_s29 }
 0x61e   :  { %513 = vadd.xlane.f32.xlu0 %v512_v56  ;;  %1003 = vmatprep.subr.bf16.mxu1 %v1002_v11 }
 0x61f   :  { %1005 = vmatpush3.bf16.msra.mxu1 %v1002_v11  ;;  %1039 = vmatprep.subr.bf16.mxu0 %v1038_v52  ;;  %v665_v11 = vsub.s32 5, %v1210_v10  ;;  %p1115_p3 = por %p1114_p2, %p1113_p1 }
 0x620   :  { %1007 = vmatprep.subr.bf16.mxu1 %v1006_v15 }
 0x621   :  { %1041 = vmatpush3.bf16.msra.mxu0 %v1038_v52  ;;  %v666_v13 = vrot.slane %v1216_v12, %v665_v11  ;;  %p1116_p4 = pnand %p1115_p3, %p1109_p0 }
 0x623   :  { %1009 = vmatpush3.bf16.msra.mxu1 %v1006_v15 }
 0x6aa   :  { %v517_v57 = vpop.xlane.xlu1 %516 }
 0x6ab   :  { %v520_v58 = vmul.f32 0.03125, %v517_v57  ;;  %v514_v59 = vpop.xlane.xlu0 %513 }
 0x6ac   :  { %v519_v60 = vmul.f32 0.03125, %v514_v59 }
 0x6ad   :  { %v522_v61 = vsub.f32 %v511_v53, %v520_v58  ;;  %v553_v53 = vsub.s32 4, %v1210_v10 }
 0x6ae   :  { %v521_v62 = vsub.f32 %v510_v54, %v519_v60 }
 0x6af   :  { %v524_v7 = vmul.f32 %v522_v61, %v522_v61  ;;  %v554_v54 = vrot.slane %v1216_v12, %v553_v53 }
 0x6b0   :  { %v523_v63 = vmul.f32 %v521_v62, %v521_v62 }
 0x6b1   :  { %v528_v8 = vsel %vm40_vm0, %v524_v7, 0.0 }
 0x6b2   :  { %v525_v4 = vsel %vm40_vm0, %v523_v63, 0.0 }
 0x6b3   :  { %526 = vadd.xlane.f32.xlu0 %v525_v4 }
 0x6b7   :  { %529 = vadd.xlane.f32.xlu0 %v528_v8 }
 0x740   :  { %v527_v25 = vpop.xlane.xlu0 %526 }
 0x741   :  { %v531_v0 = vmul.f32 0.03125, %v527_v25 }
 0x743   :  { %v533_v1 = vadd.f32 1e-12, %v531_v0 }
 0x744   :  { %v530_v3 = vpop.xlane.xlu0 %529 }
 0x745   :  { %1096 = vrsqrt.f32 %v533_v1  ;;  %v532_v2 = vmul.f32 0.03125, %v530_v3 }
 0x747   :  { %v534_v5 = vadd.f32 1e-12, %v532_v2 }
 0x749   :  { %1098 = vrsqrt.f32 %v534_v5 }
 0x74f   :  { %v1097_v29 = vpop.eup %1096 }
 0x750   :  { %v537_v30 = vmul.f32 %v1097_v29, %v521_v62 }
 0x752   :  { %v543_v32 = vmul.f32 %v542_v28, %v537_v30 }
 0x753   :  { %v1099_v33 = vpop.eup %1098 }
 0x754   :  { %v538_v34 = vmul.f32 %v1099_v33, %v522_v61  ;;  %v549_v35 = vadd.f32 %v548_v31, %v543_v32  ;;  %v772_v33 = vsub.s32 6, %v1210_v10 }
 0x756   :  { %v544_v36 = vmul.f32 %v542_v28, %v538_v34  ;;  %928 = vmatprep.mubr.msk.f32.mxu1 %vm40_vm0, %v549_v35  ;;  %v778_v34 = vsub.s32 7, %v1210_v10 }
 0x758   :  { %v550_v37 = vadd.f32 %v548_v31, %v544_v36  ;;  %v779_v39 = vrot.slane %v1216_v12, %v778_v34 }
 0x75a   :  { %929 = vmatmul.mubr.msk.f32.vlgmr.msra.gmra.mrb[10].mxu1 %vm40_vm0, %v550_v37 }
 0x82d   :  { %v930_v55 = vpop.f32.mrb[10].mxu1 }
 0x82e   :  { %v633_v56 = vadd.f32 %v930_v55, %v554_v54  ;;  %v627_v57 = vpop.f32.mrb[11].mxu1 }
 0x82f   :  { %v628_v58 = vadd.f32 %v627_v57, %v554_v54 }
 0x830   :  { %v640_v59 = vmul.f32 0.70710677, %v633_v56  ;;  %v637_v8 = vmul.f32 0.5, %v633_v56 }
 0x831   :  { %v639_v60 = vmul.f32 0.70710677, %v628_v58  ;;  %v636_v4 = vmul.f32 0.5, %v628_v58 }
 0x832   :  { %1100 = verf.f32 %v640_v59 }
 0x833   :  { %1102 = verf.f32 %v639_v60 }
 0x83c   :  { %v1101_v61 = vpop.eup %1100 }
 0x83d   :  { %v1103_v62 = vpop.eup %1102  ;;  %v644_v63 = vadd.f32 1.0, %v1101_v61 }
 0x83e   :  { %v643_v7 = vadd.f32 1.0, %v1103_v62 }
 0x83f   :  { %v646_v9 = vmul.f32 %v644_v63, %v637_v8 }
 0x840   :  { %v645_v6 = vmul.f32 %v643_v7, %v636_v4 }
 0x842   :  { %963 = vmatprep.mubr.f32.mxu0 %v645_v6 }
 0x843   :  { %964 = vmatmul.mubr.f32.vlgmr.msra.gmra.mrb[2].mxu0 %v646_v9 }
 0x916   :  { %v965_v14 = vpop.f32.mrb[2].mxu0 }
 0x917   :  { %v739_v15 = vadd.f32 %v965_v14, %v666_v13  ;;  %v733_v16 = vpop.f32.mrb[3].mxu0 }
 0x918   :  { %v734_v17 = vadd.f32 %v733_v16, %v666_v13 }
 0x919   :  { %v743_v19 = vadd.f32 %v739_v15, %v550_v37 }
 0x91a   :  { %v742_v20 = vadd.f32 %v734_v17, %v549_v35  ;;  %v773_v35 = vrot.slane %v1216_v12, %v772_v33 }
 0x91b   :  { %v747_v21 = vsel %vm40_vm0, %v743_v19, 0.0 }
 0x91c   :  { %748 = vadd.xlane.f32.xlu0 %v747_v21  ;;  %v744_v18 = vsel %vm40_vm0, %v742_v20, 0.0 }
 0x91d   :  { %745 = vadd.xlane.f32.xlu1 %v744_v18 }
 0x9a9   :  { %v749_v22 = vpop.xlane.xlu0 %748 }
 0x9aa   :  { %v751_v23 = vmul.f32 0.03125, %v749_v22  ;;  %v746_v24 = vpop.xlane.xlu1 %745 }
 0x9ab   :  { %v750_v25 = vmul.f32 0.03125, %v746_v24 }
 0x9ac   :  { %v753_v0 = vsub.f32 %v743_v19, %v751_v23 }
 0x9ad   :  { %v752_v1 = vsub.f32 %v742_v20, %v750_v25 }
 0x9ae   :  { %v755_v3 = vmul.f32 %v753_v0, %v753_v0 }
 0x9af   :  { %v754_v2 = vmul.f32 %v752_v1, %v752_v1 }
 0x9b0   :  { %v759_v5 = vsel %vm40_vm0, %v755_v3, 0.0 }
 0x9b1   :  { %760 = vadd.xlane.f32.xlu0 %v759_v5  ;;  %v756_v26 = vsel %vm40_vm0, %v754_v2, 0.0 }
 0x9b2   :  { %757 = vadd.xlane.f32.xlu1 %v756_v26 }
 0xa3e   :  { %v761_v27 = vpop.xlane.xlu0 %760 }
 0xa3f   :  { %v763_v28 = vmul.f32 0.03125, %v761_v27  ;;  %v758_v29 = vpop.xlane.xlu1 %757 }
 0xa40   :  { %v762_v30 = vmul.f32 0.03125, %v758_v29 }
 0xa41   :  { %v765_v31 = vadd.f32 1e-12, %v763_v28 }
 0xa42   :  { %v764_v32 = vadd.f32 1e-12, %v762_v30 }
 0xa43   :  { %1104 = vrsqrt.f32 %v765_v31 }
 0xa44   :  { %1106 = vrsqrt.f32 %v764_v32 }
 0xa4d   :  { %v1105_v36 = vpop.eup %1104 }
 0xa4e   :  { %v1107_v37 = vpop.eup %1106  ;;  %v769_v38 = vmul.f32 %v1105_v36, %v753_v0 }
 0xa4f   :  { %v768_v40 = vmul.f32 %v1107_v37, %v752_v1 }
 0xa50   :  { %v775_v41 = vmul.f32 %v773_v35, %v769_v38 }
 0xa51   :  { %v774_v42 = vmul.f32 %v773_v35, %v768_v40 }
 0xa52   :  { %v781_v43 = vadd.f32 %v779_v39, %v775_v41 }
 0xa53   :  { %v780_v44 = vadd.f32 %v779_v39, %v774_v42 }
 0xa54   :  { %783 = vst.msk [vmem:[#allocation2 + $0x8] sm:$0xff] %vm40_vm0, %v781_v43 }
 0xa55   :  { %782 = vst.msk [vmem:[#allocation2] sm:$0xff] %vm40_vm0, %v780_v44 }
 0xa56   :  { %1119 = shalt.err (!%p1116_p4)
}
 0xa57   :  { %s1120_s0 = scalar_lea.hbm %s1371_s5, 256 }
 0xa58   :  { %p1121_p5 = scmp.ne.s32.totalorder %s1371_s5, %s1120_s0  ;;  %p1124_p6 = scmp.lt.u32.totalorder %s1120_s0, %s1371_s5 }
 0xa5a   :  { %p1126_p7 = pnand %p1124_p6, %p1121_p5 }
 0xa5c   :  { %1129 = shalt.err (!%p1126_p7)
}
 0xa5d   :  { %s1138_s9 = smov 128   ;;  %s1139_s10 = smov 8  }
 0xa5e   :  { %795 = dma.vmem_to_hbm [thread:$0]  %s790_s28, 256, %s1371_s5, [#allocation3], %s1138_s9, %s1138_s9, %s1139_s10  }
 0xa5f   :  { %1130 = dma.done.wait [#allocation3], 256  }
 0xa60   :  { %1131 = vsyncadd [#allocation3], 4294967040 }
 0xa61   :  { %799 = vsyncpa [#allocation3], 1 }

</bundles_post_ra>
